<compile_context>
chip_gen: v5e
topology: v5e:2x2
jax: 0.10.0
libtpu: 0.0.40
codegen_flags: <defaults>
</compile_context>

<pallas_src>
import jax
import jax.numpy as jnp
from jax import lax
from jax.experimental import pallas as pl
from jax.experimental.pallas import tpu as pltpu

MARGIN = 0.1


def gci0_kernel(idx_ref, table_ref, out_ref):
    # idx_ref:   (1, 2*TN) int32 -- [C ids | D ids] for this tile of pairs
    # table_ref: (D+1, K)  f32   -- rows 0..D-1: class embeddings^T; row D: |radius|
    # out_ref:   (1, TN)   f32   -- gci0 score per pair (lane-dense row)
    ids = idx_ref[...]
    k = table_ref.shape[1]
    dim = table_ref.shape[0] - 1
    two_tn = ids.shape[1]
    tn = two_tn // 2

    # Stacked one-hot gather masks (K, 2*TN): columns 0..TN-1 select the C rows,
    # columns TN..2TN-1 select the D rows.  A single MXU matmul gathers both
    # sides plus the fused |radius| row at once.
    iota = lax.broadcasted_iota(jnp.int32, (k, two_tn), 0)
    oh = (iota == ids).astype(jnp.float32)

    g = jnp.dot(table_ref[...], oh, preferred_element_type=jnp.float32)  # (D+1, 2TN)

    diff = g[:, :tn] - g[:, tn:]           # rows 0..D-1: c - d ; row D: |rc| - |rd|
    emb_diff = diff[:dim, :]
    d2 = jnp.sum(emb_diff * emb_diff, axis=0, keepdims=True)  # (1, TN) sublane reduce
    r_diff = diff[dim:, :]                                    # (1, TN)
    dist = jnp.sqrt(d2)                                       # EUP slot
    out_ref[...] = jnp.maximum(dist + r_diff - MARGIN, 0.0)


def infer_gci0(x, class_embed, class_rad, *, tile_n=256):
    """x: (bs, num_classes, 2) int indices -> (bs, num_classes) f32 scores."""
    bs, num_classes, ents = x.shape
    assert ents == 2
    n = bs * num_classes
    n_tiles = pl.cdiv(n, tile_n)
    n_pad = n_tiles * tile_n

    idx = x.reshape(n, 2).astype(jnp.int32)
    # Pad the pair list with class 0; padded scores are discarded below.
    idx = jnp.pad(idx, ((0, n_pad - n), (0, 0)))
    c_ids = idx[:, 0].reshape(n_tiles, tile_n)
    d_ids = idx[:, 1].reshape(n_tiles, tile_n)
    # Per-tile stacked id row: (n_tiles, 1, 2*tile_n) = [C ids | D ids].
    idx2 = jnp.concatenate([c_ids, d_ids], axis=1).reshape(n_tiles, 1, 2 * tile_n)

    k, dim = class_embed.shape
    # Fused, transposed class table: (D+1, K); |radius| folded in as last row.
    table = jnp.concatenate(
        [class_embed.T.astype(jnp.float32),
         jnp.abs(class_rad).astype(jnp.float32).reshape(1, k)],
        axis=0)

    # TODO(synk): for large ontologies (K >~ 1e4) replace the one-hot MXU gather
    # with a scalar-prefetch / manual-DMA row gather (one-hot masks become FLOP-
    # and VMEM-prohibitive for big class tables, especially on v7x's 64 MiB VMEM).

    cost = pl.CostEstimate(
        flops=int(2 * (dim + 1) * k * 2 * n_pad),
        transcendentals=int(n_pad),
        bytes_accessed=int(table.size * 4 + idx2.size * 4 + n_pad * 4),
    )

    out = pl.pallas_call(
        gci0_kernel,
        out_shape=jax.ShapeDtypeStruct((n_tiles, 1, tile_n), jnp.float32),
        grid_spec=pltpu.PrefetchScalarGridSpec(
            num_scalar_prefetch=0,
            grid=(n_tiles,),
            in_specs=[
                # Per-tile stacked indices (leading grid dim squeezed out).
                pl.BlockSpec((None, 1, 2 * tile_n), lambda i: (i, 0, 0)),
                # Resident fused table: untiled VMEM, no per-step double-buffer.
                pl.BlockSpec(memory_space=pltpu.MemorySpace.VMEM),
            ],
            out_specs=pl.BlockSpec((None, 1, tile_n), lambda i: (i, 0, 0)),
        ),
        compiler_params=pltpu.CompilerParams(
            dimension_semantics=("parallel",),
            vmem_limit_bytes=32 * 1024 * 1024,
        ),
        cost_estimate=cost,
    )(idx2, table)

    return out.reshape(n_pad)[:n].reshape(bs, num_classes)


def infer_gci0_ref(x, class_embed, class_rad):
    bs, num_classes, _ = x.shape
    idx = x.reshape(-1, 2)
    c = class_embed[idx[:, 0]]
    d = class_embed[idx[:, 1]]
    rc = jnp.abs(class_rad[idx[:, 0]])
    rd = jnp.abs(class_rad[idx[:, 1]])
    dist = jnp.linalg.norm(c - d, axis=1, keepdims=True) + rc - rd
    return jax.nn.relu(dist - MARGIN).reshape(bs, num_classes)


if __name__ == "__main__":
    key = jax.random.PRNGKey(0)
    k_idx, k_emb, k_rad = jax.random.split(key, 3)

    bs, num_classes = 2, 100      # n = 200 -> padded to 256 -> 1 grid tile
    num_total_classes, embed_dim = 32, 32

    x = jax.random.randint(k_idx, (bs, num_classes, 2), 0, num_total_classes,
                           dtype=jnp.int32)
    class_embed = jax.random.normal(k_emb, (num_total_classes, embed_dim),
                                    dtype=jnp.float32)
    class_rad = jax.random.normal(k_rad, (num_total_classes, 1),
                                  dtype=jnp.float32)

    out = infer_gci0(x, class_embed, class_rad)
    out = jax.block_until_ready(out)

    ref = infer_gci0_ref(x, class_embed, class_rad)
    assert out.shape == (bs, num_classes)
    assert jnp.allclose(out, ref, atol=1e-5, rtol=1e-5)
    print("KERNEL_OK")
</pallas_src>

<mosaic_0001>
module attributes {stable_mosaic.version = 11 : i64} {
  func.func @gci0_kernel(%arg0: i32, %arg1: memref<1x1x512xi32, #tpu.memory_space<vmem>>, %arg2: memref<33x32xf32, #tpu.memory_space<vmem>>, %arg3: memref<1x1x256xf32, #tpu.memory_space<vmem>>) attributes {dimension_semantics = [#tpu.dimension_semantics<parallel>], iteration_bounds = array<i64: 1>, scalar_prefetch = 0 : i64, scratch_operands = 0 : i64, tpu.core_type = #tpu.core_type<tc>, window_params = [{transform_indices = @transform_0, window_bounds = array<i64: 1, 1, 512>}, {pipeline_mode = #tpu.pipeline_mode<synchronous>, transform_indices = @transform_1, window_bounds = array<i64: 33, 32>}, {transform_indices = @transform_2, window_bounds = array<i64: 1, 1, 256>}]} {
    %c0 = arith.constant 0 : index
    %c0_0 = arith.constant 0 : index
    %c0_1 = arith.constant 0 : index
    %0 = vector.load %arg1[%c0, %c0_0, %c0_1] : memref<1x1x512xi32, #tpu.memory_space<vmem>>, vector<1x1x512xi32>
    %1 = vector.shape_cast %0 : vector<1x1x512xi32> to vector<1x512xi32>
    %2 = tpu.iota {dimensions = array<i32: 0>} : vector<32x512xi32>
    %3 = vector.broadcast %1 : vector<1x512xi32> to vector<32x512xi32>
    %4 = arith.cmpi eq, %2, %3 : vector<32x512xi32>
    %5 = arith.extui %4 : vector<32x512xi1> to vector<32x512xi32>
    %6 = arith.sitofp %5 : vector<32x512xi32> to vector<32x512xf32>
    %c0_2 = arith.constant 0 : index
    %c0_3 = arith.constant 0 : index
    %7 = vector.load %arg2[%c0_2, %c0_3] : memref<33x32xf32, #tpu.memory_space<vmem>>, vector<33x32xf32>
    %cst = arith.constant dense<0.000000e+00> : vector<33x512xf32>
    %8 = tpu.matmul %7, %6, %cst {dimension_numbers = #tpu.dot_dimension_numbers<[1], [0], [0], [1], [0, 0, 1, 1], [], []>} : vector<33x32xf32>, vector<32x512xf32>, vector<33x512xf32> -> vector<33x512xf32>
    %9 = vector.extract_strided_slice %8 {offsets = [0, 0], sizes = [33, 256], strides = [1, 1]} : vector<33x512xf32> to vector<33x256xf32>
    %10 = vector.extract_strided_slice %8 {offsets = [0, 256], sizes = [33, 256], strides = [1, 1]} : vector<33x512xf32> to vector<33x256xf32>
    %11 = arith.subf %9, %10 : vector<33x256xf32>
    %12 = vector.extract_strided_slice %11 {offsets = [0, 0], sizes = [32, 256], strides = [1, 1]} : vector<33x256xf32> to vector<32x256xf32>
    %13 = arith.mulf %12, %12 : vector<32x256xf32>
    %cst_4 = arith.constant dense<0.000000e+00> : vector<256xf32>
    %14 = vector.multi_reduction <add>, %13, %cst_4 [0] : vector<32x256xf32> to vector<256xf32>
    %15 = vector.shape_cast %14 : vector<256xf32> to vector<1x256xf32>
    %16 = vector.extract_strided_slice %11 {offsets = [32, 0], sizes = [1, 256], strides = [1, 1]} : vector<33x256xf32> to vector<1x256xf32>
    %17 = math.sqrt %15 : vector<1x256xf32>
    %18 = arith.addf %17, %16 : vector<1x256xf32>
    %cst_5 = arith.constant 1.000000e-01 : f32
    %19 = vector.broadcast %cst_5 : f32 to vector<1x256xf32>
    %20 = arith.subf %18, %19 : vector<1x256xf32>
    %cst_6 = arith.constant 0.000000e+00 : f32
    %21 = vector.broadcast %cst_6 : f32 to vector<1x256xf32>
    %22 = arith.maximumf %20, %21 : vector<1x256xf32>
    %c0_7 = arith.constant 0 : index
    %c0_8 = arith.constant 0 : index
    %c0_9 = arith.constant 0 : index
    %23 = vector.load %arg3[%c0_7, %c0_8, %c0_9] : memref<1x1x256xf32, #tpu.memory_space<vmem>>, vector<1x1x256xf32>
    %24 = vector.shape_cast %23 : vector<1x1x256xf32> to vector<1x256xf32>
    %25 = vector.shape_cast %22 : vector<1x256xf32> to vector<1x1x256xf32>
    tpu.vector_store %arg3[%c0_7, %c0_8, %c0_9], %25 {strides = array<i32>} : memref<1x1x256xf32, #tpu.memory_space<vmem>>, vector<1x1x256xf32>,
    return
  }
  func.func @transform_0(%arg0: i32) -> (i32, i32, i32) {
    %c0_i32 = arith.constant 0 : i32
    %c0_i32_0 = arith.constant 0 : i32
    %c0_i32_1 = arith.constant 0 : i32
    return %arg0, %c0_i32, %c0_i32_0 : i32, i32, i32
  }
  func.func @transform_1(%arg0: i32) -> (i32, i32) {
    %c0_i32 = arith.constant 0 : i32
    %c0_i32_0 = arith.constant 0 : i32
    %c0_i32_1 = arith.constant 0 : i32
    return %c0_i32, %c0_i32_0 : i32, i32
  }
  func.func @transform_2(%arg0: i32) -> (i32, i32, i32) {
    %c0_i32 = arith.constant 0 : i32
    %c0_i32_0 = arith.constant 0 : i32
    %c0_i32_1 = arith.constant 0 : i32
    return %arg0, %c0_i32, %c0_i32_0 : i32, i32, i32
  }
}

</mosaic_0001>

<bundles_post_ra>
// kernel: tpu_custom_call.1
= control target key start
LH: loop header
LB: loop body
LE: loop exit
PB: predicated region body
PF: predicated region fallthrough
CT: control target
= control target key end

     0   :  { %v13_v1 = vlaneseq  ;;  %s458_s0 = inlined_call_operand.vmem [shape: s32[1,1,512], index: 0, kind: input, shape index: {}]   ;;  %s459_s1 = inlined_call_operand.vmem [shape: f32[33,32], index: 1, kind: input, shape index: {}]   ;;  %s460_s2 = inlined_call_operand.hbm [shape: f32[1,1,256], index: 2, kind: output, shape index: {}]  }
   0x1   :  { %v12_v0 = vld [vmem:[%s458_s0] sm:$0xf] }
   0x2   :  { %v14_v2 = vshrl.u32 %v13_v1, 7  ;;  %v20_v3 = vperm.slane %v12_v0, 2  ;;  %v21_v4 = vperm.slane %v12_v0, 3 }
   0x3   :  { %7 = vsyncpa [#allocation3], 0  ;;  %v18_v5 = vperm.slane %v12_v0, 0  ;;  %v19_v9 = vperm.slane %v12_v0, 1  ;;  %v398_v10 = vmov 1.0   ;;  %v70_v11 = vld [vmem:[%s459_s1] sm:$0xff] }
   0x4   :  { %v17_v6 = vadd.s32 24, %v14_v2  ;;  %v16_v7 = vadd.s32 16, %v14_v2  ;;  %v15_v8 = vadd.s32 8, %v14_v2  ;;  %vm24_vm11 = vcmp.eq.s32.totalorder %v14_v2, %v20_v3  ;;  %v71_v12 = vld [vmem:[%s459_s1 + $0x8] sm:$0xff]  ;;  %v72_v13 = vld [vmem:[%s459_s1 + $0x10] sm:$0xff]  ;;  %v73_v14 = vld [vmem:[%s459_s1 + $0x18] sm:$0xff] }
   0x5   :  { %vm25_vm12 = vcmp.eq.s32.totalorder %v14_v2, %v21_v4  ;;  %vm75_vm13 = vcmask 261120   ;;  %vm22_vm15 = vcmp.eq.s32.totalorder %v14_v2, %v18_v5  ;;  %v74_v15 = vld [vmem:[%s459_s1 + $0x20] sm:$0x1]  ;;  %s399_s1 = smov [#allocation2]   ;;  %s303_s23 = sshll.u32 %s460_s2, 4  ;;  %s304_s23 = int_to_ptr.hbm [resolvable:$true] %s303_s23 }
   0x6   :  { %vm36_vm0 = vcmp.eq.s32.totalorder %v17_v6, %v20_v3  ;;  %vm37_vm1 = vcmp.eq.s32.totalorder %v17_v6, %v21_v4  ;;  %vm32_vm2 = vcmp.eq.s32.totalorder %v16_v7, %v20_v3  ;;  %vm33_vm3 = vcmp.eq.s32.totalorder %v16_v7, %v21_v4  ;;  %s301_s20 = sshll.u32 %s399_s1, 4  ;;  %s302_s20 = int_to_ptr.vmem [resolvable:$true] %s301_s20 }
   0x7   :  { %346 = vmatpush.msk.msra.mxu2 %vm36_vm0, %v398_v10  ;;  %355 = vmatpush.msk.msra.mxu3 %vm37_vm1, %v398_v10  ;;  %vm34_vm4 = vcmp.eq.s32.totalorder %v17_v6, %v18_v5  ;;  %vm28_vm5 = vcmp.eq.s32.totalorder %v15_v8, %v20_v3  ;;  %vm29_vm6 = vcmp.eq.s32.totalorder %v15_v8, %v21_v4 }
   0x8   :  { %328 = vmatpush.msk.msra.mxu0 %vm34_vm4, %v398_v10  ;;  %vm35_vm7 = vcmp.eq.s32.totalorder %v17_v6, %v19_v9  ;;  %vm30_vm8 = vcmp.eq.s32.totalorder %v16_v7, %v18_v5  ;;  %vm31_vm9 = vcmp.eq.s32.totalorder %v16_v7, %v19_v9  ;;  %vm26_vm10 = vcmp.eq.s32.totalorder %v15_v8, %v18_v5 }
   0x9   :  { %347 = vmatpush.msk.msra.mxu2 %vm32_vm2, %v398_v10  ;;  %356 = vmatpush.msk.msra.mxu3 %vm33_vm3, %v398_v10  ;;  %vm27_vm14 = vcmp.eq.s32.totalorder %v15_v8, %v19_v9  ;;  %vm23_vm0 = vcmp.eq.s32.totalorder %v14_v2, %v19_v9 }
   0xa   :  { %337 = vmatpush.msk.msra.mxu1 %vm35_vm7, %v398_v10  ;;  %329 = vmatpush.msk.msra.mxu0 %vm30_vm8, %v398_v10 }
   0xb   :  { %348 = vmatpush.msk.msra.mxu2 %vm28_vm5, %v398_v10  ;;  %357 = vmatpush.msk.msra.mxu3 %vm29_vm6, %v398_v10  ;;  %vm288_vm5 = vcmask 1040384   ;;  %vm293_vm6 = vcmp.lt.s32.totalorder %v13_v1, 256 }
   0xc   :  { %338 = vmatpush.msk.msra.mxu1 %vm31_vm9, %v398_v10  ;;  %330 = vmatpush.msk.msra.mxu0 %vm26_vm10, %v398_v10 }
   0xd   :  { %349 = vmatpush.msk.msra.mxu2 %vm24_vm11, %v398_v10  ;;  %358 = vmatpush.msk.msra.mxu3 %vm25_vm12, %v398_v10 }
   0xe   :  { %350 = vmatmul.msk.f32.vlgmr.msra.gmra.mxu2 %vm75_vm13, %v70_v11  ;;  %359 = vmatmul.msk.f32.vlgmr.msra.gmra.mxu3 %vm75_vm13, %v70_v11 }
   0xf   :  { %339 = vmatpush.msk.msra.mxu1 %vm27_vm14, %v398_v10  ;;  %331 = vmatpush.msk.msra.mxu0 %vm22_vm15, %v398_v10 }
  0x10   :  { %332 = vmatmul.msk.f32.vlgmr.msra.gmra.mxu0 %vm75_vm13, %v70_v11 }
  0x11   :  { %340 = vmatpush.msk.msra.mxu1 %vm23_vm0, %v398_v10 }
  0x12   :  { %341 = vmatmul.msk.f32.vlgmr.msra.gmra.mxu1 %vm75_vm13, %v70_v11 }
  0x16   :  { %351 = vmatmul.msk.f32.gmra.mxu2 %vm75_vm13, %v71_v12  ;;  %360 = vmatmul.msk.f32.gmra.mxu3 %vm75_vm13, %v71_v12 }
  0x18   :  { %333 = vmatmul.msk.f32.gmra.mxu0 %vm75_vm13, %v71_v12 }
  0x1a   :  { %342 = vmatmul.msk.f32.gmra.mxu1 %vm75_vm13, %v71_v12 }
  0x1e   :  { %352 = vmatmul.msk.f32.gmra.mxu2 %vm75_vm13, %v72_v13  ;;  %361 = vmatmul.msk.f32.gmra.mxu3 %vm75_vm13, %v72_v13 }
  0x20   :  { %334 = vmatmul.msk.f32.gmra.mxu0 %vm75_vm13, %v72_v13 }
  0x22   :  { %343 = vmatmul.msk.f32.gmra.mxu1 %vm75_vm13, %v72_v13 }
  0x26   :  { %353 = vmatmul.msk.f32.gmra.mxu2 %vm75_vm13, %v73_v14  ;;  %362 = vmatmul.msk.f32.gmra.mxu3 %vm75_vm13, %v73_v14 }
  0x28   :  { %335 = vmatmul.msk.f32.gmra.mxu0 %vm75_vm13, %v73_v14 }
  0x2a   :  { %344 = vmatmul.msk.f32.gmra.mxu1 %vm75_vm13, %v73_v14 }
  0x2e   :  { %354 = vmatmul.msk.f32.gmra.mxu2 %vm75_vm13, %v74_v15  ;;  %363 = vmatmul.msk.f32.gmra.mxu3 %vm75_vm13, %v74_v15 }
  0x30   :  { %336 = vmatmul.msk.f32.gmra.mxu0 %vm75_vm13, %v74_v15 }
  0x32   :  { %345 = vmatmul.msk.f32.gmra.mxu1 %vm75_vm13, %v74_v15 }
  0x8d   :  { %v108_v16 = vpop.f32.mrf.mxu0 }
  0x8f   :  { %v140_v17 = vpop.f32.mrf.mxu1 }
  0x91   :  { %v172_v18 = vpop.f32.mrf.mxu2  ;;  %v204_v19 = vpop.f32.mrf.mxu3 }
  0x92   :  { %v219_v30 = vsub.f32 %v108_v16, %v172_v18  ;;  %v220_v31 = vsub.f32 %v140_v17, %v204_v19 }
  0x94   :  { %v229_v38 = vmul.f32 %v219_v30, %v219_v30  ;;  %v230_v39 = vmul.f32 %v220_v31, %v220_v31 }
  0x95   :  { %v111_v20 = vpop.f32.mrf.mxu0 }
  0x97   :  { %v143_v21 = vpop.f32.mrf.mxu1 }
  0x99   :  { %v175_v22 = vpop.f32.mrf.mxu2  ;;  %v207_v23 = vpop.f32.mrf.mxu3 }
  0x9a   :  { %v221_v28 = vsub.f32 %v111_v20, %v175_v22  ;;  %v222_v29 = vsub.f32 %v143_v21, %v207_v23 }
  0x9c   :  { %v231_v34 = vmul.f32 %v221_v28, %v221_v28  ;;  %v232_v35 = vmul.f32 %v222_v29, %v222_v29 }
  0x9d   :  { %v114_v24 = vpop.f32.mrf.mxu0 }
  0x9e   :  { %v237_v44 = vadd.f32 %v231_v34, %v229_v38  ;;  %v246_v45 = vadd.f32 %v232_v35, %v230_v39 }
  0x9f   :  { %v146_v25 = vpop.f32.mrf.mxu1 }
  0xa1   :  { %v178_v26 = vpop.f32.mrf.mxu2  ;;  %v210_v27 = vpop.f32.mrf.mxu3 }
  0xa2   :  { %v223_v32 = vsub.f32 %v114_v24, %v178_v26  ;;  %v224_v33 = vsub.f32 %v146_v25, %v210_v27 }
  0xa4   :  { %v233_v40 = vmul.f32 %v223_v32, %v223_v32  ;;  %v234_v41 = vmul.f32 %v224_v33, %v224_v33 }
  0xa5   :  { %v117_v36 = vpop.f32.mrf.mxu0 }
  0xa6   :  { %v238_v48 = vadd.f32 %v237_v44, %v233_v40  ;;  %v247_v49 = vadd.f32 %v246_v45, %v234_v41 }
  0xa7   :  { %v149_v37 = vpop.f32.mrf.mxu1 }
  0xa9   :  { %v181_v42 = vpop.f32.mrf.mxu2  ;;  %v213_v43 = vpop.f32.mrf.mxu3 }
  0xaa   :  { %v225_v46 = vsub.f32 %v117_v36, %v181_v42  ;;  %v226_v47 = vsub.f32 %v149_v37, %v213_v43 }
  0xac   :  { %v235_v50 = vmul.f32 %v225_v46, %v225_v46  ;;  %v236_v51 = vmul.f32 %v226_v47, %v226_v47 }
  0xad   :  { %v120_v12 = vpop.f32.mrf.mxu0 }
  0xae   :  { %v239_v52 = vadd.f32 %v238_v48, %v235_v50  ;;  %v248_v53 = vadd.f32 %v247_v49, %v236_v51 }
  0xaf   :  { %v152_v15 = vpop.f32.mrf.mxu1 }
  0xb0   :  { %v240_v54 = vrot.slane %v239_v52, 4  ;;  %v249_v55 = vrot.slane %v248_v53, 4 }
  0xb1   :  { %v184_v13 = vpop.f32.mrf.mxu2  ;;  %v216_v17 = vpop.f32.mrf.mxu3 }
  0xb2   :  { %v241_v56 = vadd.f32 %v240_v54, %v239_v52  ;;  %v250_v57 = vadd.f32 %v249_v55, %v248_v53  ;;  %v227_v19 = vsub.f32 %v120_v12, %v184_v13  ;;  %v228_v22 = vsub.f32 %v152_v15, %v216_v17 }
  0xb4   :  { %v242_v58 = vrot.slane %v241_v56, 2  ;;  %v251_v59 = vrot.slane %v250_v57, 2 }
  0xb6   :  { %v243_v60 = vadd.f32 %v242_v58, %v241_v56  ;;  %v252_v61 = vadd.f32 %v251_v59, %v250_v57 }
  0xb8   :  { %v244_v62 = vrot.slane %v243_v60, 1  ;;  %v253_v63 = vrot.slane %v252_v61, 1 }
  0xba   :  { %v245_v0 = vadd.f32 %v244_v62, %v243_v60  ;;  %v254_v2 = vadd.f32 %v253_v63, %v252_v61 }
  0xbc   :  { %368 = vrsqrt.f32 %v245_v0  ;;  %vm262_vm1 = vcmp.eq.f32.partialorder %v245_v0, inf  ;;  %v265_v21 = vand.u32 2147483648, %v245_v0  ;;  %vm264_vm2 = vcmp.eq.f32.partialorder %v245_v0, 0.0 }
  0xbd   :  { %370 = vrsqrt.f32 %v254_v2  ;;  %vm274_vm3 = vcmp.eq.f32.partialorder %v254_v2, inf  ;;  %v277_v25 = vand.u32 2147483648, %v254_v2  ;;  %vm276_vm4 = vcmp.eq.f32.partialorder %v254_v2, 0.0 }
  0xc2   :  { %v369_v3 = vpop.eup %368 }
  0xc3   :  { %v371_v4 = vpop.eup %370  ;;  %v256_v5 = vmul.f32 %v369_v3, %v245_v0 }
  0xc4   :  { %v268_v6 = vmul.f32 %v371_v4, %v254_v2 }
  0xc5   :  { %v257_v7 = vmul.f32 %v369_v3, %v256_v5 }
  0xc6   :  { %v269_v8 = vmul.f32 %v371_v4, %v268_v6 }
  0xc7   :  { %v258_v9 = vmul.f32 0.5, %v257_v7 }
  0xc8   :  { %v270_v10 = vmul.f32 0.5, %v269_v8 }
  0xc9   :  { %v259_v11 = vsub.f32 1.5, %v258_v9 }
  0xca   :  { %v271_v14 = vsub.f32 1.5, %v270_v10 }
  0xcb   :  { %v260_v16 = vmul.f32 %v369_v3, %v259_v11 }
  0xcc   :  { %v272_v18 = vmul.f32 %v371_v4, %v271_v14 }
  0xcd   :  { %v261_v20 = vmul.f32 %v260_v16, %v245_v0 }
  0xce   :  { %v273_v23 = vmul.f32 %v272_v18, %v254_v2 }
  0xcf   :  { %v263_v24 = vsel %vm262_vm1, %v245_v0, %v261_v20 }
  0xd0   :  { %v266_v26 = vsel %vm264_vm2, %v265_v21, %v263_v24  ;;  %v275_v27 = vsel %vm274_vm3, %v254_v2, %v273_v23 }
  0xd1   :  { %v279_v28 = vadd.f32 %v266_v26, %v227_v19  ;;  %v278_v29 = vsel %vm276_vm4, %v277_v25, %v275_v27 }
  0xd2   :  { %v280_v30 = vadd.f32 %v278_v29, %v228_v22 }
  0xd3   :  { %v364_v31 = vadd.f32 -0.1, %v279_v28 }
  0xd4   :  { %v365_v32 = vadd.f32 -0.1, %v280_v30 }
  0xd5   :  { %v283_v34 = vmax.f32 %v364_v31, 0.0 }
  0xd6   :  { %v284_v33 = vmax.f32 %v365_v32, 0.0 }
  0xd8   :  { %v287_v35 = vrot.slane %v284_v33, 7 }
  0xda   :  { %v289_v36 = vsel %vm288_vm5, %v283_v34, %v287_v35 }
  0xdb   :  { %295 = vst.msk [vmem:[#allocation2] sm:$0x3] %vm293_vm6, %v289_v36 }
  0xdc   :  { %306 = dma.vmem_to_hbm [thread:$0]  %s302_s20, 32, %s304_s23, [#allocation3]  }
  0xdd   :  { %396 = dma.done.wait [#allocation3], 32  }
  0xde   :  { %397 = vsyncadd [#allocation3], 4294967264 }
  0xdf   :  { %311 = vsyncpa [#allocation3], 1 }

</bundles_post_ra>
